<compile_context>
chip_gen: v7x
topology: tpu7x:2x2x1
jax: 0.10.0
libtpu: 0.0.40
codegen_flags: <defaults>
</compile_context>

<pallas_src>
import functools

import jax
import jax.numpy as jnp
from jax.experimental import pallas as pl
from jax.experimental.pallas import tpu as pltpu

_LANES = 128
_MAX_TILE_ROWS = 8192                    # 8192 * 128 * 4 B = 4 MiB per f32 input block
_VMEM_LIMIT_BYTES = 40 * 1024 * 1024     # explicit: covers 2 inputs x 2 buffers x 4 MiB


def _sublane_align(dtype) -> int:
    """Rows-per-vreg packing granule: f32 -> 8, bf16 -> 16, int8/fp8 -> 32."""
    return max(8, 32 // jnp.dtype(dtype).itemsize)


def _charbonnier_partial_kernel(p_ref, t_ref, acc_ref, *, eps2, steps, steps_per_shard):
    """Accumulates sum(sqrt((p - t)^2 + eps^2)) for one shard into an (8,128) vector."""
    s = pl.program_id(0)   # shard (TensorCore) axis, "parallel"
    i = pl.program_id(1)   # reduction axis within the shard, "arbitrary"

    @pl.when(i == 0)
    def _():
        acc_ref[...] = jnp.zeros_like(acc_ref)

    # Ragged guard: with steps_per_shard = cdiv(steps, num_shards), shard 1's last
    # step may fall past the end. Its (clamped, duplicate) block is streamed but
    # not accumulated, keeping the result exact.
    @pl.when(s * steps_per_shard + i < steps)
    def _():
        d = p_ref[...].astype(jnp.float32) - t_ref[...].astype(jnp.float32)
        v = jnp.sqrt(d * d + jnp.float32(eps2))
        # (tile_rows, 128) -> (8, 128) with plain vector adds; the layout-preserving
        # reshape groups native 8-row sublane tiles. The expensive cross-lane/sublane
        # reduce to a scalar happens once, outside the kernel.
        partial = jnp.sum(v.reshape(-1, 8, _LANES), axis=0)
        acc_ref[...] += partial[None, :, :]


def charbonnier_loss(
    preds: jax.Array,
    targets: jax.Array,
    epsilon: float = 1e-6,
    *,
    max_tile_rows: int = _MAX_TILE_ROWS,
) -> jax.Array:
    """Pallas-TPU Charbonnier loss, matching torch.mean(sqrt((p-t)^2 + eps^2))."""
    assert preds.shape == targets.shape, "preds/targets must have the same shape"

    eps2 = float(epsilon) * float(epsilon)
    n = preds.size
    p_flat = preds.reshape(-1)
    t_flat = targets.reshape(-1)

    # Tile rows must be a multiple of the packing granule of BOTH input dtypes
    # (f32: 8, bf16: 16, int8/fp8: 32) so packed layouts tile cleanly.
    align = max(_sublane_align(preds.dtype), _sublane_align(targets.dtype))
    rows_total = n // _LANES

    main_sum = jnp.float32(0.0)
    n_main = 0

    if rows_total >= align:
        tile_rows = min((max_tile_rows // align) * align, (rows_total // align) * align)
        tile_rows = max(tile_rows, align)
        steps = rows_total // tile_rows
        # Always split across 2 TensorCores when there is more than one step
        # (v7x win; a no-op on single-core v5e/v6e). Ragged last step is guarded
        # in the kernel, so odd step counts are fine.
        num_shards = 2 if steps >= 2 else 1
        steps_per_shard = -(-steps // num_shards)  # cdiv
        rows_main = steps * tile_rows
        n_main = rows_main * _LANES

        p_main = p_flat[:n_main].reshape(rows_main, _LANES)
        t_main = t_flat[:n_main].reshape(rows_main, _LANES)

        kernel = functools.partial(
            _charbonnier_partial_kernel,
            eps2=eps2,
            steps=steps,
            steps_per_shard=steps_per_shard,
        )

        def in_map(s, i):
            g = s * steps_per_shard + i
            # Clamp so the (skipped) ragged step never addresses an OOB block.
            return (jnp.minimum(g, steps - 1), 0)

        bytes_per_elem = p_flat.dtype.itemsize + t_flat.dtype.itemsize
        cost = pl.CostEstimate(
            flops=4 * n_main,                 # sub + mul + add + accumulate
            transcendentals=n_main,           # sqrt (EUP)
            bytes_accessed=n_main * bytes_per_elem + num_shards * 8 * _LANES * 4,
        )

        partials = pl.pallas_call(
            kernel,
            out_shape=jax.ShapeDtypeStruct((num_shards, 8, _LANES), jnp.float32),
            grid_spec=pltpu.PrefetchScalarGridSpec(
                num_scalar_prefetch=0,
                grid=(num_shards, steps_per_shard),
                in_specs=[
                    pl.BlockSpec((tile_rows, _LANES), in_map),
                    pl.BlockSpec((tile_rows, _LANES), in_map),
                ],
                out_specs=pl.BlockSpec((1, 8, _LANES), lambda s, i: (s, 0, 0)),
            ),
            compiler_params=pltpu.CompilerParams(
                dimension_semantics=("parallel", "arbitrary"),
                vmem_limit_bytes=_VMEM_LIMIT_BYTES,
            ),
            cost_estimate=cost,
        )(p_main, t_main)
        main_sum = jnp.sum(partials)

    # Remainder (< one tile): handled in plain JAX, in f32 so eps^2=1e-12 doesn't flush.
    if n_main < n:
        p_tail = p_flat[n_main:].astype(jnp.float32)
        t_tail = t_flat[n_main:].astype(jnp.float32)
        tail_sum = jnp.sum(jnp.sqrt((p_tail - t_tail) ** 2 + jnp.float32(eps2)))
    else:
        tail_sum = jnp.float32(0.0)

    return (main_sum + tail_sum) / jnp.float32(n)


if __name__ == "__main__":
    key = jax.random.PRNGKey(0)

    def ref_loss(p, t, eps=1e-6):
        pf = p.astype(jnp.float32)
        tf = t.astype(jnp.float32)
        return jnp.mean(jnp.sqrt((pf - tf) ** 2 + jnp.float32(eps) ** 2))

    # Case 1: small NCHW f32 input (module's typical usage), default tiling.
    k1, k2 = jax.random.split(key)
    p1 = jax.random.normal(k1, (2, 4, 16, 16), dtype=jnp.float32)
    t1 = jax.random.normal(k2, (2, 4, 16, 16), dtype=jnp.float32)
    out1 = jax.block_until_ready(charbonnier_loss(p1, t1, epsilon=1e-6))
    assert jnp.allclose(out1, ref_loss(p1, t1), rtol=1e-5, atol=1e-6), (out1, ref_loss(p1, t1))

    # Case 2: f32 with an odd step count (9 steps of 8 rows) to exercise the
    # always-on 2-shard split and the ragged-last-step guard.
    k3, k4 = jax.random.split(k1)
    p2 = jax.random.normal(k3, (3, 3, 32, 32), dtype=jnp.float32)   # 9216 elems = 72 rows
    t2 = jax.random.normal(k4, (3, 3, 32, 32), dtype=jnp.float32)
    out2 = jax.block_until_ready(charbonnier_loss(p2, t2, max_tile_rows=8))
    assert jnp.allclose(out2, ref_loss(p2, t2), rtol=1e-5, atol=1e-6), (out2, ref_loss(p2, t2))

    # Case 3: bf16 inputs (half the HBM traffic), 16/32-row-aligned tiles.
    k5, k6 = jax.random.split(k3)
    p3 = jax.random.normal(k5, (2, 4, 32, 32), dtype=jnp.bfloat16)  # 8192 elems = 64 rows
    t3 = jax.random.normal(k6, (2, 4, 32, 32), dtype=jnp.bfloat16)
    out3 = jax.block_until_ready(charbonnier_loss(p3, t3, max_tile_rows=32))
    assert jnp.allclose(out3, ref_loss(p3, t3), rtol=1e-5, atol=1e-6), (out3, ref_loss(p3, t3))

    print("KERNEL_OK")
</pallas_src>

<mosaic_0001>
module attributes {stable_mosaic.version = 11 : i64} {
  func.func @_charbonnier_partial_kernel(%arg0: i32, %arg1: i32, %arg2: memref<16x128xf32, #tpu.memory_space<vmem>>, %arg3: memref<16x128xf32, #tpu.memory_space<vmem>>, %arg4: memref<1x8x128xf32, #tpu.memory_space<vmem>>) attributes {dimension_semantics = [#tpu.dimension_semantics<parallel>, #tpu.dimension_semantics<arbitrary>], iteration_bounds = array<i64: 1, 1>, scalar_prefetch = 0 : i64, scratch_operands = 0 : i64, tpu.core_type = #tpu.core_type<tc>, window_params = [{transform_indices = @transform_0, window_bounds = array<i64: 16, 128>}, {transform_indices = @transform_1, window_bounds = array<i64: 16, 128>}, {transform_indices = @transform_2, window_bounds = array<i64: 1, 8, 128>}]} {
    %c0_i32 = arith.constant 0 : i32
    %0 = arith.cmpi eq, %arg1, %c0_i32 : i32
    %1 = arith.extui %0 : i1 to i32
    %c0_i32_0 = arith.constant 0 : i32
    %2 = arith.cmpi ne, %1, %c0_i32_0 : i32
    scf.if %2 {
      %cst = arith.constant 0.000000e+00 : f32
      %8 = vector.broadcast %cst : f32 to vector<1x8x128xf32>
      %c0 = arith.constant 0 : index
      %c0_3 = arith.constant 0 : index
      %c0_4 = arith.constant 0 : index
      %9 = vector.load %arg4[%c0, %c0_3, %c0_4] : memref<1x8x128xf32, #tpu.memory_space<vmem>>, vector<1x8x128xf32>
      tpu.vector_store %arg4[%c0, %c0_3, %c0_4], %8 {strides = array<i32>} : memref<1x8x128xf32, #tpu.memory_space<vmem>>, vector<1x8x128xf32>,
    } else {
    }
    %c1_i32 = arith.constant 1 : i32
    %3 = arith.muli %arg0, %c1_i32 : i32
    %4 = arith.addi %3, %arg1 : i32
    %c1_i32_1 = arith.constant 1 : i32
    %5 = arith.cmpi slt, %4, %c1_i32_1 : i32
    %6 = arith.extui %5 : i1 to i32
    %c0_i32_2 = arith.constant 0 : i32
    %7 = arith.cmpi ne, %6, %c0_i32_2 : i32
    scf.if %7 {
      %c0 = arith.constant 0 : index
      %c0_3 = arith.constant 0 : index
      %8 = vector.load %arg2[%c0, %c0_3] : memref<16x128xf32, #tpu.memory_space<vmem>>, vector<16x128xf32>
      %c0_4 = arith.constant 0 : index
      %c0_5 = arith.constant 0 : index
      %9 = vector.load %arg3[%c0_4, %c0_5] : memref<16x128xf32, #tpu.memory_space<vmem>>, vector<16x128xf32>
      %10 = arith.subf %8, %9 : vector<16x128xf32>
      %11 = arith.mulf %10, %10 : vector<16x128xf32>
      %cst = arith.constant 9.99999996E-13 : f32
      %12 = vector.broadcast %cst : f32 to vector<16x128xf32>
      %13 = arith.addf %11, %12 : vector<16x128xf32>
      %14 = math.sqrt %13 : vector<16x128xf32>
      %15 = vector.shape_cast %14 : vector<16x128xf32> to vector<2x8x128xf32>
      %cst_6 = arith.constant dense<0.000000e+00> : vector<8x128xf32>
      %16 = vector.multi_reduction <add>, %15, %cst_6 [0] : vector<2x8x128xf32> to vector<8x128xf32>
      %c0_7 = arith.constant 0 : index
      %c0_8 = arith.constant 0 : index
      %c0_9 = arith.constant 0 : index
      %17 = vector.load %arg4[%c0_7, %c0_8, %c0_9] : memref<1x8x128xf32, #tpu.memory_space<vmem>>, vector<1x8x128xf32>
      %18 = vector.shape_cast %16 : vector<8x128xf32> to vector<1x8x128xf32>
      %19 = arith.addf %17, %18 : vector<1x8x128xf32>
      %c0_10 = arith.constant 0 : index
      %c0_11 = arith.constant 0 : index
      %c0_12 = arith.constant 0 : index
      %20 = vector.load %arg4[%c0_10, %c0_11, %c0_12] : memref<1x8x128xf32, #tpu.memory_space<vmem>>, vector<1x8x128xf32>
      tpu.vector_store %arg4[%c0_10, %c0_11, %c0_12], %19 {strides = array<i32>} : memref<1x8x128xf32, #tpu.memory_space<vmem>>, vector<1x8x128xf32>,
    } else {
    }
    return
  }
  func.func @transform_0(%arg0: i32, %arg1: i32) -> (i32, i32) {
    %c1_i32 = arith.constant 1 : i32
    %0 = arith.muli %arg0, %c1_i32 : i32
    %1 = arith.addi %0, %arg1 : i32
    %c0_i32 = arith.constant 0 : i32
    %2 = arith.minsi %1, %c0_i32 : i32
    %c0_i32_0 = arith.constant 0 : i32
    %c0_i32_1 = arith.constant 0 : i32
    return %2, %c0_i32_0 : i32, i32
  }
  func.func @transform_1(%arg0: i32, %arg1: i32) -> (i32, i32) {
    %c1_i32 = arith.constant 1 : i32
    %0 = arith.muli %arg0, %c1_i32 : i32
    %1 = arith.addi %0, %arg1 : i32
    %c0_i32 = arith.constant 0 : i32
    %2 = arith.minsi %1, %c0_i32 : i32
    %c0_i32_0 = arith.constant 0 : i32
    %c0_i32_1 = arith.constant 0 : i32
    return %2, %c0_i32_0 : i32, i32
  }
  func.func @transform_2(%arg0: i32, %arg1: i32) -> (i32, i32, i32) {
    %c0_i32 = arith.constant 0 : i32
    %c0_i32_0 = arith.constant 0 : i32
    %c0_i32_1 = arith.constant 0 : i32
    return %arg0, %c0_i32, %c0_i32_0 : i32, i32, i32
  }
}

</mosaic_0001>

<bundles_post_ra>
// kernel: tpu_custom_call.1
= control target key start
LH: loop header
LB: loop body
LE: loop exit
PB: predicated region body
PF: predicated region fallthrough
CT: control target
= control target key end

     0   :  { %7 = vsyncpa [#allocation3], 0  ;;  %s256_s0 = inlined_call_operand.hbm [shape: f32[16,128], index: 0, kind: input, shape index: {}]   ;;  %s257_s1 = inlined_call_operand.hbm [shape: f32[16,128], index: 1, kind: input, shape index: {}]   ;;  %s258_s2 = inlined_call_operand.hbm [shape: f32[1,8,128], index: 2, kind: output, shape index: {}]  }
   0x1   :  { %8 = vsyncpa [#allocation6], 0 }
   0x2   :  { %9 = vsyncpa [#allocation4], 0  ;;  %s200_s9 = smov [#allocation2]   ;;  %s128_s13 = scalar_lea.hbm %s256_s0, 256 }
   0x3   :  { %s21_s10 = sshll.u32 %s200_s9, 4  ;;  %p129_p0 = scmp.ne.s32.totalorder %s256_s0, %s128_s13  ;;  %s22_s10 = int_to_ptr.vmem [resolvable:$true] %s21_s10 }
   0x4   :  { %p132_p1 = scmp.lt.u32.totalorder %s128_s13, %s256_s0 }
   0x6   :  { %p134_p2 = pnand %p132_p1, %p129_p0 }
   0x8   :  { %137 = shalt.err (!%p134_p2)
}
   0x9   :  { %s138_s18 = scalar_lea.vmem %s22_s10, 256  ;;  %p143_p4 = scmp.lt.s32.totalorder %s22_s10, %s22_s10 }
   0xa   :  { %p139_p3 = scmp.ne.s32.totalorder %s22_s10, %s138_s18  ;;  %p144_p5 = scmp.lt.s32.totalorder %s138_s18, %s138_s18 }
   0xc   :  { %p145_p6 = por %p144_p5, %p143_p4 }
   0xe   :  { %p146_p7 = pnand %p145_p6, %p139_p3 }
  0x10   :  { %149 = shalt.err (!%p146_p7)
}
  0x11   :  { %s201_s19 = smov 128   ;;  %s202_s20 = smov 8  }
  0x12   :  { %27 = dma.hbm_to_vmem [thread:$0]  %s256_s0, 256, %s22_s10, [#allocation3], %s201_s19, %s201_s19, %s202_s20  }
  0x13   :  { %s203_s23 = smov [#allocation5]   ;;  %s150_s27 = scalar_lea.hbm %s257_s1, 256 }
  0x14   :  { %s39_s24 = sshll.u32 %s203_s23, 4  ;;  %p151_p8 = scmp.ne.s32.totalorder %s257_s1, %s150_s27  ;;  %s40_s24 = int_to_ptr.vmem [resolvable:$true] %s39_s24 }
  0x15   :  { %p154_p9 = scmp.lt.u32.totalorder %s150_s27, %s257_s1 }
  0x17   :  { %p156_p10 = pnand %p154_p9, %p151_p8 }
  0x19   :  { %159 = shalt.err (!%p156_p10)
}
  0x1a   :  { %s160_s4 = scalar_lea.vmem %s40_s24, 256  ;;  %p165_p12 = scmp.lt.s32.totalorder %s40_s24, %s40_s24 }
  0x1b   :  { %p161_p11 = scmp.ne.s32.totalorder %s40_s24, %s160_s4  ;;  %p166_p13 = scmp.lt.s32.totalorder %s160_s4, %s160_s4 }
  0x1d   :  { %p167_p0 = por %p166_p13, %p165_p12 }
  0x1f   :  { %p168_p1 = pnand %p167_p0, %p161_p11 }
  0x21   :  { %171 = shalt.err (!%p168_p1)
}
  0x22   :  { %45 = dma.hbm_to_vmem [thread:$0]  %s257_s1, 256, %s40_s24, [#allocation6], %s201_s19, %s201_s19, %s202_s20  }
  0x23   :  { %194 = dma.done.wait [#allocation3], 256  }
  0x24   :  { %195 = vsyncadd [#allocation3], 4294967040 }
  0x25   :  { %196 = dma.done.wait [#allocation6], 256  }
  0x26   :  { %197 = vsyncadd [#allocation6], 4294967040  ;;  %v70_v0 = vld [vmem:[#allocation2] sm:$0xff]  ;;  %v71_v1 = vld [vmem:[#allocation2 + $0x8] sm:$0xff]  ;;  %s204_s1 = smov [#allocation7]  }
  0x27   :  { %v72_v2 = vld [vmem:[#allocation5] sm:$0xff]  ;;  %v73_v3 = vld [vmem:[#allocation5 + $0x8] sm:$0xff]  ;;  %s104_s6 = sshll.u32 %s204_s1, 4  ;;  %s105_s6 = int_to_ptr.vmem [resolvable:$true] %s104_s6 }
  0x28   :  { %v74_v4 = vsub.f32 %v70_v0, %v72_v2  ;;  %v75_v5 = vsub.f32 %v71_v1, %v73_v3  ;;  %s172_s7 = scalar_lea.vmem %s105_s6, 128  ;;  %p177_p3 = scmp.lt.s32.totalorder %s105_s6, %s105_s6 }
  0x29   :  { %p173_p2 = scmp.ne.s32.totalorder %s105_s6, %s172_s7  ;;  %p178_p4 = scmp.lt.s32.totalorder %s172_s7, %s172_s7 }
  0x2a   :  { %v76_v6 = vmul.f32 %v74_v4, %v74_v4  ;;  %v77_v7 = vmul.f32 %v75_v5, %v75_v5 }
  0x2b   :  { %p179_p5 = por %p178_p4, %p177_p3 }
  0x2c   :  { %v78_v8 = vadd.f32 1e-12, %v76_v6  ;;  %v79_v9 = vadd.f32 1e-12, %v77_v7 }
  0x2d   :  { %p180_p6 = pnand %p179_p5, %p173_p2 }
  0x2e   :  { %124 = vrsqrt.f32 %v78_v8  ;;  %vm82_vm0 = vcmp.eq.f32.partialorder %v78_v8, inf  ;;  %v85_v11 = vand.u32 2147483648, %v78_v8  ;;  %vm84_vm1 = vcmp.eq.f32.partialorder %v78_v8, 0.0 }
  0x2f   :  { %126 = vrsqrt.f32 %v79_v9  ;;  %vm89_vm2 = vcmp.eq.f32.partialorder %v79_v9, inf  ;;  %v92_v14 = vand.u32 2147483648, %v79_v9  ;;  %vm91_vm3 = vcmp.eq.f32.partialorder %v79_v9, 0.0 }
  0x38   :  { %v125_v10 = vpop.eup %124 }
  0x39   :  { %v127_v12 = vpop.eup %126  ;;  %v81_v13 = vmul.f32 %v125_v10, %v78_v8 }
  0x3a   :  { %v88_v15 = vmul.f32 %v127_v12, %v79_v9 }
  0x3b   :  { %v83_v16 = vsel %vm82_vm0, %v78_v8, %v81_v13 }
  0x3c   :  { %v86_v17 = vsel %vm84_vm1, %v85_v11, %v83_v16  ;;  %v90_v18 = vsel %vm89_vm2, %v79_v9, %v88_v15 }
  0x3d   :  { %v93_v19 = vsel %vm91_vm3, %v92_v14, %v90_v18 }
  0x3e   :  { %v94_v20 = vadd.f32 %v93_v19, %v86_v17 }
  0x40   :  { %97 = vst [vmem:[#allocation7] sm:$0xff] %v94_v20 }
  0x41   :  { %183 = shalt.err (!%p180_p6)
}
  0x42   :  { %s184_s10 = scalar_lea.hbm %s258_s2, 128 }
  0x43   :  { %p185_p7 = scmp.ne.s32.totalorder %s258_s2, %s184_s10  ;;  %p188_p8 = scmp.lt.u32.totalorder %s184_s10, %s258_s2 }
  0x45   :  { %p190_p9 = pnand %p188_p8, %p185_p7 }
  0x47   :  { %193 = shalt.err (!%p190_p9)
}
  0x48   :  { %107 = dma.vmem_to_hbm [thread:$0]  %s105_s6, 128, %s258_s2, [#allocation4]  }
  0x49   :  { %198 = dma.done.wait [#allocation4], 128  }
  0x4a   :  { %199 = vsyncadd [#allocation4], 4294967168 }
  0x4b   :  { %111 = vsyncpa [#allocation3], 1 }
  0x4c   :  { %112 = vsyncpa [#allocation6], 1 }
  0x4d   :  { %113 = vsyncpa [#allocation4], 1 }

</bundles_post_ra>
